<compile_context>
chip_gen: v6e
topology: v6e:2x2x1
jax: 0.10.0
libtpu: 0.0.40
codegen_flags: <defaults>
</compile_context>

<pallas_src>
import jax
import jax.numpy as jnp
from jax import lax
from jax.experimental import pallas as pl
from jax.experimental.pallas import tpu as pltpu


def rnn_fused_kernel(ids_ref,                       # SMEM (T, B) int32 token ids
                     h0_ref, w_ih_ref, w_hh_ref,    # inputs (VMEM)
                     w_out_ref, b_out_ref,
                     logits_ref, state_out_ref,     # outputs (VMEM)
                     x_buf, y_ref):                 # scratch (VMEM)
    T, B = ids_ref.shape

    w_hh = w_hh_ref[...]          # (H, H) -- loaded once, stays in vregs
    h = h0_ref[0]                 # (B, H) recurrent state carried in vregs

    # Recurrence, fully unrolled (T is small and static) so the LLO scheduler can
    # interleave the MXU push, EUP tanh and VMEM stores across steps.
    for t in range(T):
        # One-hot @ W_ih^T + b  ==  gather of the (W_ih^T + b) row for each token.
        for b in range(B):
            x_buf[b:b + 1, :] = w_ih_ref[ids_ref[t, b]]       # (1, H) gathered row
        h = jnp.tanh(x_buf[...]
                     + jnp.dot(h, w_hh, preferred_element_type=jnp.float32))
        y_ref[t * B:(t + 1) * B, :] = h                       # stash h_t for decoder

    # Final hidden state, written once.
    state_out_ref[0] = h

    # Decoder hoisted out of the loop: one lane-dense (T*B, H) @ (H, V_pad) matmul.
    logits_ref[...] = (jnp.dot(y_ref[...], w_out_ref[...],
                               preferred_element_type=jnp.float32)
                       + b_out_ref[...])


def rnn_model_forward(inputs, state, params):
    """inputs: (B, T) int32 token ids; state: (1, B, H) f32.

    Returns (logits (T*B, V), new_state (1, B, H)) matching RNNModel.forward.
    """
    w_ih_t, w_hh_t, b_h, w_out_t, b_out = params
    B, T = inputs.shape
    V, H = w_ih_t.shape
    V_pad = ((V + 127) // 128) * 128          # lane-dense decoder output width

    # Fold the recurrent bias into the gather table; (V, 1, H) so the kernel can
    # dynamically index the leading dim with a token id.
    w_ih_fold = (w_ih_t + b_h).reshape(V, 1, H)

    # Pad decoder weights/bias along vocab so logits stores are full 128-lane.
    w_out_pad = jnp.zeros((H, V_pad), jnp.float32).at[:, :V].set(w_out_t)
    b_out_pad = jnp.zeros((1, V_pad), jnp.float32).at[:, :V].set(b_out)

    ids = inputs.T.astype(jnp.int32)          # (T, B), sequence-major like nn.RNN

    logits_pad, new_state = pl.pallas_call(
        rnn_fused_kernel,
        out_shape=(
            jax.ShapeDtypeStruct((T * B, V_pad), jnp.float32),   # padded logits
            jax.ShapeDtypeStruct((1, B, H), jnp.float32),        # final hidden state
        ),
        grid_spec=pltpu.PrefetchScalarGridSpec(
            num_scalar_prefetch=1,            # token ids -> SMEM
            grid=(1,),                        # whole sequence in one grid point
            in_specs=[
                pl.BlockSpec((1, B, H), lambda i, ids: (0, 0, 0)),     # h0
                pl.BlockSpec((V, 1, H), lambda i, ids: (0, 0, 0)),     # W_ih^T + b
                pl.BlockSpec((H, H), lambda i, ids: (0, 0)),           # W_hh^T
                pl.BlockSpec((H, V_pad), lambda i, ids: (0, 0)),       # W_out^T (padded)
                pl.BlockSpec((1, V_pad), lambda i, ids: (0, 0)),       # b_out (padded)
            ],
            out_specs=[
                pl.BlockSpec((T * B, V_pad), lambda i, ids: (0, 0)),
                pl.BlockSpec((1, B, H), lambda i, ids: (0, 0, 0)),
            ],
            scratch_shapes=[
                pltpu.VMEM((B, H), jnp.float32),        # gathered x_t staging
                pltpu.VMEM((T * B, H), jnp.float32),    # Y = stacked hidden states
            ],
        ),
        compiler_params=pltpu.CompilerParams(
            dimension_semantics=("arbitrary",),
        ),
    )(ids, state, w_ih_fold, w_hh_t, w_out_pad, b_out_pad)

    output = logits_pad[:, :V]                # strip lane padding (pure glue)
    return output, new_state


def rnn_model_reference(inputs, state, params):
    """Pure-JAX reference (one-hot formulation), for correctness checking."""
    w_ih_t, w_hh_t, b_h, w_out_t, b_out = params
    V = w_ih_t.shape[0]
    X = jax.nn.one_hot(inputs.T, V, dtype=jnp.float32)       # (T, B, V)

    def step(h, x):
        h = jnp.tanh(jnp.dot(x, w_ih_t, precision=lax.Precision.HIGHEST)
                     + jnp.dot(h, w_hh_t, precision=lax.Precision.HIGHEST)
                     + b_h)
        return h, h

    h_last, ys = lax.scan(step, state[0], X)
    out = jnp.dot(ys.reshape(-1, ys.shape[-1]), w_out_t,
                  precision=lax.Precision.HIGHEST) + b_out
    return out, h_last[None]


def init_params(key, vocab_size, num_hiddens):
    """Deterministic init mimicking PyTorch's U(-1/sqrt(H), 1/sqrt(H))."""
    k1, k2, k3, k4, k5, k6 = jax.random.split(key, 6)
    bound = 1.0 / jnp.sqrt(jnp.float32(num_hiddens))
    u = lambda k, shape: jax.random.uniform(
        k, shape, jnp.float32, minval=-bound, maxval=bound)
    # Stored pre-transposed as (in_features, out_features) for x @ W.
    w_ih_t = u(k1, (vocab_size, num_hiddens))                  # == W_ih^T
    w_hh_t = u(k2, (num_hiddens, num_hiddens))                 # == W_hh^T
    b_h = u(k3, (1, num_hiddens)) + u(k4, (1, num_hiddens))    # b_ih + b_hh
    w_out_t = u(k5, (num_hiddens, vocab_size))                 # == W_linear^T
    b_out = u(k6, (1, vocab_size))
    return (w_ih_t, w_hh_t, b_h, w_out_t, b_out)


if __name__ == "__main__":
    # Small shapes consistent with the module's forward.
    batch_size = 2
    num_steps = 8
    vocab_size = 28
    num_hiddens = 32

    key = jax.random.PRNGKey(0)
    kp, ki = jax.random.split(key)

    params = init_params(kp, vocab_size, num_hiddens)

    # Token-id inputs of shape (batch, num_steps), as in the PyTorch forward.
    inputs = jax.random.randint(ki, (batch_size, num_steps), 0, vocab_size,
                                dtype=jnp.int32)
    # begin_state: zeros of shape (num_directions * num_layers, B, H) = (1, B, H)
    state0 = jnp.zeros((1, batch_size, num_hiddens), dtype=jnp.float32)

    output, state = rnn_model_forward(inputs, state0, params)
    jax.block_until_ready((output, state))

    assert output.shape == (num_steps * batch_size, vocab_size)
    assert state.shape == (1, batch_size, num_hiddens)

    # Correctness check against the pure-JAX one-hot reference.
    ref_out, ref_state = rnn_model_reference(inputs, state0, params)
    assert float(jnp.max(jnp.abs(output - ref_out))) < 5e-2
    assert float(jnp.max(jnp.abs(state - ref_state))) < 5e-2

    print("KERNEL_OK")
</pallas_src>

<mosaic_0001>
module attributes {stable_mosaic.version = 11 : i64} {
  func.func @rnn_fused_kernel(%arg0: i32, %arg1: memref<8x2xi32, #tpu.memory_space<smem>>, %arg2: memref<1x2x32xf32, #tpu.memory_space<vmem>>, %arg3: memref<28x1x32xf32, #tpu.memory_space<vmem>>, %arg4: memref<32x32xf32, #tpu.memory_space<vmem>>, %arg5: memref<32x128xf32, #tpu.memory_space<vmem>>, %arg6: memref<1x128xf32, #tpu.memory_space<vmem>>, %arg7: memref<16x128xf32, #tpu.memory_space<vmem>>, %arg8: memref<1x2x32xf32, #tpu.memory_space<vmem>>, %arg9: memref<2x32xf32, #tpu.memory_space<vmem>>, %arg10: memref<16x32xf32, #tpu.memory_space<vmem>>) attributes {dimension_semantics = [#tpu.dimension_semantics<arbitrary>], iteration_bounds = array<i64: 1>, scalar_prefetch = 1 : i64, scratch_operands = 2 : i64, tpu.core_type = #tpu.core_type<tc>, window_params = [{pipeline_mode = #tpu.pipeline_mode<synchronous>, transform_indices = @transform_0, window_bounds = array<i64: 1, 2, 32>}, {pipeline_mode = #tpu.pipeline_mode<synchronous>, transform_indices = @transform_1, window_bounds = array<i64: 28, 1, 32>}, {pipeline_mode = #tpu.pipeline_mode<synchronous>, transform_indices = @transform_2, window_bounds = array<i64: 32, 32>}, {pipeline_mode = #tpu.pipeline_mode<synchronous>, transform_indices = @transform_3, window_bounds = array<i64: 32, 128>}, {pipeline_mode = #tpu.pipeline_mode<synchronous>, transform_indices = @transform_4, window_bounds = array<i64: 1, 128>}, {pipeline_mode = #tpu.pipeline_mode<synchronous>, transform_indices = @transform_5, window_bounds = array<i64: 16, 128>}, {pipeline_mode = #tpu.pipeline_mode<synchronous>, transform_indices = @transform_6, window_bounds = array<i64: 1, 2, 32>}]} {
    %c0 = arith.constant 0 : index
    %c0_0 = arith.constant 0 : index
    %0 = vector.load %arg4[%c0, %c0_0] : memref<32x32xf32, #tpu.memory_space<vmem>>, vector<32x32xf32>
    %c0_1 = arith.constant 0 : index
    %c0_2 = arith.constant 0 : index
    %c0_3 = arith.constant 0 : index
    %1 = vector.load %arg2[%c0_1, %c0_2, %c0_3] : memref<1x2x32xf32, #tpu.memory_space<vmem>>, vector<1x2x32xf32>
    %2 = vector.shape_cast %1 : vector<1x2x32xf32> to vector<2x32xf32>
    %c0_4 = arith.constant 0 : index
    %c0_5 = arith.constant 0 : index
    %3 = memref.load %arg1[%c0_4, %c0_5] : memref<8x2xi32, #tpu.memory_space<smem>>
    %4 = arith.index_cast %3 : i32 to index
    %c0_6 = arith.constant 0 : index
    %c0_7 = arith.constant 0 : index
    %5 = vector.load %arg3[%4, %c0_6, %c0_7] : memref<28x1x32xf32, #tpu.memory_space<vmem>>, vector<1x1x32xf32>
    %6 = vector.shape_cast %5 : vector<1x1x32xf32> to vector<1x32xf32>
    %c0_8 = arith.constant 0 : index
    %c0_9 = arith.constant 0 : index
    %7 = vector.load %arg9[%c0_8, %c0_9] : memref<2x32xf32, #tpu.memory_space<vmem>>, vector<1x32xf32>
    tpu.vector_store %arg9[%c0_8, %c0_9], %6 {strides = array<i32>} : memref<2x32xf32, #tpu.memory_space<vmem>>, vector<1x32xf32>,
    %c0_10 = arith.constant 0 : index
    %c1 = arith.constant 1 : index
    %8 = memref.load %arg1[%c0_10, %c1] : memref<8x2xi32, #tpu.memory_space<smem>>
    %9 = arith.index_cast %8 : i32 to index
    %c0_11 = arith.constant 0 : index
    %c0_12 = arith.constant 0 : index
    %10 = vector.load %arg3[%9, %c0_11, %c0_12] : memref<28x1x32xf32, #tpu.memory_space<vmem>>, vector<1x1x32xf32>
    %11 = vector.shape_cast %10 : vector<1x1x32xf32> to vector<1x32xf32>
    %c1_13 = arith.constant 1 : index
    %c0_14 = arith.constant 0 : index
    %12 = vector.load %arg9[%c1_13, %c0_14] : memref<2x32xf32, #tpu.memory_space<vmem>>, vector<1x32xf32>
    tpu.vector_store %arg9[%c1_13, %c0_14], %11 {strides = array<i32>} : memref<2x32xf32, #tpu.memory_space<vmem>>, vector<1x32xf32>,
    %c0_15 = arith.constant 0 : index
    %c0_16 = arith.constant 0 : index
    %13 = vector.load %arg9[%c0_15, %c0_16] : memref<2x32xf32, #tpu.memory_space<vmem>>, vector<2x32xf32>
    %cst = arith.constant dense<0.000000e+00> : vector<2x32xf32>
    %14 = tpu.matmul %2, %0, %cst {dimension_numbers = #tpu.dot_dimension_numbers<[1], [0], [0], [1], [0, 0, 1, 1], [], []>} : vector<2x32xf32>, vector<32x32xf32>, vector<2x32xf32> -> vector<2x32xf32>
    %15 = arith.addf %13, %14 : vector<2x32xf32>
    %16 = math.tanh %15 : vector<2x32xf32>
    %c0_17 = arith.constant 0 : index
    %c0_18 = arith.constant 0 : index
    %17 = vector.load %arg10[%c0_17, %c0_18] : memref<16x32xf32, #tpu.memory_space<vmem>>, vector<2x32xf32>
    tpu.vector_store %arg10[%c0_17, %c0_18], %16 {strides = array<i32>} : memref<16x32xf32, #tpu.memory_space<vmem>>, vector<2x32xf32>,
    %c1_19 = arith.constant 1 : index
    %c0_20 = arith.constant 0 : index
    %18 = memref.load %arg1[%c1_19, %c0_20] : memref<8x2xi32, #tpu.memory_space<smem>>
    %19 = arith.index_cast %18 : i32 to index
    %c0_21 = arith.constant 0 : index
    %c0_22 = arith.constant 0 : index
    %20 = vector.load %arg3[%19, %c0_21, %c0_22] : memref<28x1x32xf32, #tpu.memory_space<vmem>>, vector<1x1x32xf32>
    %21 = vector.shape_cast %20 : vector<1x1x32xf32> to vector<1x32xf32>
    %c0_23 = arith.constant 0 : index
    %c0_24 = arith.constant 0 : index
    %22 = vector.load %arg9[%c0_23, %c0_24] : memref<2x32xf32, #tpu.memory_space<vmem>>, vector<1x32xf32>
    tpu.vector_store %arg9[%c0_23, %c0_24], %21 {strides = array<i32>} : memref<2x32xf32, #tpu.memory_space<vmem>>, vector<1x32xf32>,
    %c1_25 = arith.constant 1 : index
    %c1_26 = arith.constant 1 : index
    %23 = memref.load %arg1[%c1_25, %c1_26] : memref<8x2xi32, #tpu.memory_space<smem>>
    %24 = arith.index_cast %23 : i32 to index
    %c0_27 = arith.constant 0 : index
    %c0_28 = arith.constant 0 : index
    %25 = vector.load %arg3[%24, %c0_27, %c0_28] : memref<28x1x32xf32, #tpu.memory_space<vmem>>, vector<1x1x32xf32>
    %26 = vector.shape_cast %25 : vector<1x1x32xf32> to vector<1x32xf32>
    %c1_29 = arith.constant 1 : index
    %c0_30 = arith.constant 0 : index
    %27 = vector.load %arg9[%c1_29, %c0_30] : memref<2x32xf32, #tpu.memory_space<vmem>>, vector<1x32xf32>
    tpu.vector_store %arg9[%c1_29, %c0_30], %26 {strides = array<i32>} : memref<2x32xf32, #tpu.memory_space<vmem>>, vector<1x32xf32>,
    %c0_31 = arith.constant 0 : index
    %c0_32 = arith.constant 0 : index
    %28 = vector.load %arg9[%c0_31, %c0_32] : memref<2x32xf32, #tpu.memory_space<vmem>>, vector<2x32xf32>
    %cst_33 = arith.constant dense<0.000000e+00> : vector<2x32xf32>
    %29 = tpu.matmul %16, %0, %cst_33 {dimension_numbers = #tpu.dot_dimension_numbers<[1], [0], [0], [1], [0, 0, 1, 1], [], []>} : vector<2x32xf32>, vector<32x32xf32>, vector<2x32xf32> -> vector<2x32xf32>
    %30 = arith.addf %28, %29 : vector<2x32xf32>
    %31 = math.tanh %30 : vector<2x32xf32>
    %c2 = arith.constant 2 : index
    %c0_34 = arith.constant 0 : index
    %32 = vector.load %arg10[%c2, %c0_34] : memref<16x32xf32, #tpu.memory_space<vmem>>, vector<2x32xf32>
    tpu.vector_store %arg10[%c2, %c0_34], %31 {strides = array<i32>} : memref<16x32xf32, #tpu.memory_space<vmem>>, vector<2x32xf32>,
    %c2_35 = arith.constant 2 : index
    %c0_36 = arith.constant 0 : index
    %33 = memref.load %arg1[%c2_35, %c0_36] : memref<8x2xi32, #tpu.memory_space<smem>>
    %34 = arith.index_cast %33 : i32 to index
    %c0_37 = arith.constant 0 : index
    %c0_38 = arith.constant 0 : index
    %35 = vector.load %arg3[%34, %c0_37, %c0_38] : memref<28x1x32xf32, #tpu.memory_space<vmem>>, vector<1x1x32xf32>
    %36 = vector.shape_cast %35 : vector<1x1x32xf32> to vector<1x32xf32>
    %c0_39 = arith.constant 0 : index
    %c0_40 = arith.constant 0 : index
    %37 = vector.load %arg9[%c0_39, %c0_40] : memref<2x32xf32, #tpu.memory_space<vmem>>, vector<1x32xf32>
    tpu.vector_store %arg9[%c0_39, %c0_40], %36 {strides = array<i32>} : memref<2x32xf32, #tpu.memory_space<vmem>>, vector<1x32xf32>,
    %c2_41 = arith.constant 2 : index
    %c1_42 = arith.constant 1 : index
    %38 = memref.load %arg1[%c2_41, %c1_42] : memref<8x2xi32, #tpu.memory_space<smem>>
    %39 = arith.index_cast %38 : i32 to index
    %c0_43 = arith.constant 0 : index
    %c0_44 = arith.constant 0 : index
    %40 = vector.load %arg3[%39, %c0_43, %c0_44] : memref<28x1x32xf32, #tpu.memory_space<vmem>>, vector<1x1x32xf32>
    %41 = vector.shape_cast %40 : vector<1x1x32xf32> to vector<1x32xf32>
    %c1_45 = arith.constant 1 : index
    %c0_46 = arith.constant 0 : index
    %42 = vector.load %arg9[%c1_45, %c0_46] : memref<2x32xf32, #tpu.memory_space<vmem>>, vector<1x32xf32>
    tpu.vector_store %arg9[%c1_45, %c0_46], %41 {strides = array<i32>} : memref<2x32xf32, #tpu.memory_space<vmem>>, vector<1x32xf32>,
    %c0_47 = arith.constant 0 : index
    %c0_48 = arith.constant 0 : index
    %43 = vector.load %arg9[%c0_47, %c0_48] : memref<2x32xf32, #tpu.memory_space<vmem>>, vector<2x32xf32>
    %cst_49 = arith.constant dense<0.000000e+00> : vector<2x32xf32>
    %44 = tpu.matmul %31, %0, %cst_49 {dimension_numbers = #tpu.dot_dimension_numbers<[1], [0], [0], [1], [0, 0, 1, 1], [], []>} : vector<2x32xf32>, vector<32x32xf32>, vector<2x32xf32> -> vector<2x32xf32>
    %45 = arith.addf %43, %44 : vector<2x32xf32>
    %46 = math.tanh %45 : vector<2x32xf32>
    %c4 = arith.constant 4 : index
    %c0_50 = arith.constant 0 : index
    %47 = vector.load %arg10[%c4, %c0_50] : memref<16x32xf32, #tpu.memory_space<vmem>>, vector<2x32xf32>
    tpu.vector_store %arg10[%c4, %c0_50], %46 {strides = array<i32>} : memref<16x32xf32, #tpu.memory_space<vmem>>, vector<2x32xf32>,
    %c3 = arith.constant 3 : index
    %c0_51 = arith.constant 0 : index
    %48 = memref.load %arg1[%c3, %c0_51] : memref<8x2xi32, #tpu.memory_space<smem>>
    %49 = arith.index_cast %48 : i32 to index
    %c0_52 = arith.constant 0 : index
    %c0_53 = arith.constant 0 : index
    %50 = vector.load %arg3[%49, %c0_52, %c0_53] : memref<28x1x32xf32, #tpu.memory_space<vmem>>, vector<1x1x32xf32>
    %51 = vector.shape_cast %50 : vector<1x1x32xf32> to vector<1x32xf32>
    %c0_54 = arith.constant 0 : index
    %c0_55 = arith.constant 0 : index
    %52 = vector.load %arg9[%c0_54, %c0_55] : memref<2x32xf32, #tpu.memory_space<vmem>>, vector<1x32xf32>
    tpu.vector_store %arg9[%c0_54, %c0_55], %51 {strides = array<i32>} : memref<2x32xf32, #tpu.memory_space<vmem>>, vector<1x32xf32>,
    %c3_56 = arith.constant 3 : index
    %c1_57 = arith.constant 1 : index
    %53 = memref.load %arg1[%c3_56, %c1_57] : memref<8x2xi32, #tpu.memory_space<smem>>
    %54 = arith.index_cast %53 : i32 to index
    %c0_58 = arith.constant 0 : index
    %c0_59 = arith.constant 0 : index
    %55 = vector.load %arg3[%54, %c0_58, %c0_59] : memref<28x1x32xf32, #tpu.memory_space<vmem>>, vector<1x1x32xf32>
    %56 = vector.shape_cast %55 : vector<1x1x32xf32> to vector<1x32xf32>
    %c1_60 = arith.constant 1 : index
    %c0_61 = arith.constant 0 : index
    %57 = vector.load %arg9[%c1_60, %c0_61] : memref<2x32xf32, #tpu.memory_space<vmem>>, vector<1x32xf32>
    tpu.vector_store %arg9[%c1_60, %c0_61], %56 {strides = array<i32>} : memref<2x32xf32, #tpu.memory_space<vmem>>, vector<1x32xf32>,
    %c0_62 = arith.constant 0 : index
    %c0_63 = arith.constant 0 : index
    %58 = vector.load %arg9[%c0_62, %c0_63] : memref<2x32xf32, #tpu.memory_space<vmem>>, vector<2x32xf32>
    %cst_64 = arith.constant dense<0.000000e+00> : vector<2x32xf32>
    %59 = tpu.matmul %46, %0, %cst_64 {dimension_numbers = #tpu.dot_dimension_numbers<[1], [0], [0], [1], [0, 0, 1, 1], [], []>} : vector<2x32xf32>, vector<32x32xf32>, vector<2x32xf32> -> vector<2x32xf32>
    %60 = arith.addf %58, %59 : vector<2x32xf32>
    %61 = math.tanh %60 : vector<2x32xf32>
    %c6 = arith.constant 6 : index
    %c0_65 = arith.constant 0 : index
    %62 = vector.load %arg10[%c6, %c0_65] : memref<16x32xf32, #tpu.memory_space<vmem>>, vector<2x32xf32>
    tpu.vector_store %arg10[%c6, %c0_65], %61 {strides = array<i32>} : memref<16x32xf32, #tpu.memory_space<vmem>>, vector<2x32xf32>,
    %c4_66 = arith.constant 4 : index
    %c0_67 = arith.constant 0 : index
    %63 = memref.load %arg1[%c4_66, %c0_67] : memref<8x2xi32, #tpu.memory_space<smem>>
    %64 = arith.index_cast %63 : i32 to index
    %c0_68 = arith.constant 0 : index
    %c0_69 = arith.constant 0 : index
    %65 = vector.load %arg3[%64, %c0_68, %c0_69] : memref<28x1x32xf32, #tpu.memory_space<vmem>>, vector<1x1x32xf32>
    %66 = vector.shape_cast %65 : vector<1x1x32xf32> to vector<1x32xf32>
    %c0_70 = arith.constant 0 : index
    %c0_71 = arith.constant 0 : index
    %67 = vector.load %arg9[%c0_70, %c0_71] : memref<2x32xf32, #tpu.memory_space<vmem>>, vector<1x32xf32>
    tpu.vector_store %arg9[%c0_70, %c0_71], %66 {strides = array<i32>} : memref<2x32xf32, #tpu.memory_space<vmem>>, vector<1x32xf32>,
    %c4_72 = arith.constant 4 : index
    %c1_73 = arith.constant 1 : index
    %68 = memref.load %arg1[%c4_72, %c1_73] : memref<8x2xi32, #tpu.memory_space<smem>>
    %69 = arith.index_cast %68 : i32 to index
    %c0_74 = arith.constant 0 : index
    %c0_75 = arith.constant 0 : index
    %70 = vector.load %arg3[%69, %c0_74, %c0_75] : memref<28x1x32xf32, #tpu.memory_space<vmem>>, vector<1x1x32xf32>
    %71 = vector.shape_cast %70 : vector<1x1x32xf32> to vector<1x32xf32>
    %c1_76 = arith.constant 1 : index
    %c0_77 = arith.constant 0 : index
    %72 = vector.load %arg9[%c1_76, %c0_77] : memref<2x32xf32, #tpu.memory_space<vmem>>, vector<1x32xf32>
    tpu.vector_store %arg9[%c1_76, %c0_77], %71 {strides = array<i32>} : memref<2x32xf32, #tpu.memory_space<vmem>>, vector<1x32xf32>,
    %c0_78 = arith.constant 0 : index
    %c0_79 = arith.constant 0 : index
    %73 = vector.load %arg9[%c0_78, %c0_79] : memref<2x32xf32, #tpu.memory_space<vmem>>, vector<2x32xf32>
    %cst_80 = arith.constant dense<0.000000e+00> : vector<2x32xf32>
    %74 = tpu.matmul %61, %0, %cst_80 {dimension_numbers = #tpu.dot_dimension_numbers<[1], [0], [0], [1], [0, 0, 1, 1], [], []>} : vector<2x32xf32>, vector<32x32xf32>, vector<2x32xf32> -> vector<2x32xf32>
    %75 = arith.addf %73, %74 : vector<2x32xf32>
    %76 = math.tanh %75 : vector<2x32xf32>
    %c8 = arith.constant 8 : index
    %c0_81 = arith.constant 0 : index
    %77 = vector.load %arg10[%c8, %c0_81] : memref<16x32xf32, #tpu.memory_space<vmem>>, vector<2x32xf32>
    tpu.vector_store %arg10[%c8, %c0_81], %76 {strides = array<i32>} : memref<16x32xf32, #tpu.memory_space<vmem>>, vector<2x32xf32>,
    %c5 = arith.constant 5 : index
    %c0_82 = arith.constant 0 : index
    %78 = memref.load %arg1[%c5, %c0_82] : memref<8x2xi32, #tpu.memory_space<smem>>
    %79 = arith.index_cast %78 : i32 to index
    %c0_83 = arith.constant 0 : index
    %c0_84 = arith.constant 0 : index
    %80 = vector.load %arg3[%79, %c0_83, %c0_84] : memref<28x1x32xf32, #tpu.memory_space<vmem>>, vector<1x1x32xf32>
    %81 = vector.shape_cast %80 : vector<1x1x32xf32> to vector<1x32xf32>
    %c0_85 = arith.constant 0 : index
    %c0_86 = arith.constant 0 : index
    %82 = vector.load %arg9[%c0_85, %c0_86] : memref<2x32xf32, #tpu.memory_space<vmem>>, vector<1x32xf32>
    tpu.vector_store %arg9[%c0_85, %c0_86], %81 {strides = array<i32>} : memref<2x32xf32, #tpu.memory_space<vmem>>, vector<1x32xf32>,
    %c5_87 = arith.constant 5 : index
    %c1_88 = arith.constant 1 : index
    %83 = memref.load %arg1[%c5_87, %c1_88] : memref<8x2xi32, #tpu.memory_space<smem>>
    %84 = arith.index_cast %83 : i32 to index
    %c0_89 = arith.constant 0 : index
    %c0_90 = arith.constant 0 : index
    %85 = vector.load %arg3[%84, %c0_89, %c0_90] : memref<28x1x32xf32, #tpu.memory_space<vmem>>, vector<1x1x32xf32>
    %86 = vector.shape_cast %85 : vector<1x1x32xf32> to vector<1x32xf32>
    %c1_91 = arith.constant 1 : index
    %c0_92 = arith.constant 0 : index
    %87 = vector.load %arg9[%c1_91, %c0_92] : memref<2x32xf32, #tpu.memory_space<vmem>>, vector<1x32xf32>
    tpu.vector_store %arg9[%c1_91, %c0_92], %86 {strides = array<i32>} : memref<2x32xf32, #tpu.memory_space<vmem>>, vector<1x32xf32>,
    %c0_93 = arith.constant 0 : index
    %c0_94 = arith.constant 0 : index
    %88 = vector.load %arg9[%c0_93, %c0_94] : memref<2x32xf32, #tpu.memory_space<vmem>>, vector<2x32xf32>
    %cst_95 = arith.constant dense<0.000000e+00> : vector<2x32xf32>
    %89 = tpu.matmul %76, %0, %cst_95 {dimension_numbers = #tpu.dot_dimension_numbers<[1], [0], [0], [1], [0, 0, 1, 1], [], []>} : vector<2x32xf32>, vector<32x32xf32>, vector<2x32xf32> -> vector<2x32xf32>
    %90 = arith.addf %88, %89 : vector<2x32xf32>
    %91 = math.tanh %90 : vector<2x32xf32>
    %c10 = arith.constant 10 : index
    %c0_96 = arith.constant 0 : index
    %92 = vector.load %arg10[%c10, %c0_96] : memref<16x32xf32, #tpu.memory_space<vmem>>, vector<2x32xf32>
    tpu.vector_store %arg10[%c10, %c0_96], %91 {strides = array<i32>} : memref<16x32xf32, #tpu.memory_space<vmem>>, vector<2x32xf32>,
    %c6_97 = arith.constant 6 : index
    %c0_98 = arith.constant 0 : index
    %93 = memref.load %arg1[%c6_97, %c0_98] : memref<8x2xi32, #tpu.memory_space<smem>>
    %94 = arith.index_cast %93 : i32 to index
    %c0_99 = arith.constant 0 : index
    %c0_100 = arith.constant 0 : index
    %95 = vector.load %arg3[%94, %c0_99, %c0_100] : memref<28x1x32xf32, #tpu.memory_space<vmem>>, vector<1x1x32xf32>
    %96 = vector.shape_cast %95 : vector<1x1x32xf32> to vector<1x32xf32>
    %c0_101 = arith.constant 0 : index
    %c0_102 = arith.constant 0 : index
    %97 = vector.load %arg9[%c0_101, %c0_102] : memref<2x32xf32, #tpu.memory_space<vmem>>, vector<1x32xf32>
    tpu.vector_store %arg9[%c0_101, %c0_102], %96 {strides = array<i32>} : memref<2x32xf32, #tpu.memory_space<vmem>>, vector<1x32xf32>,
    %c6_103 = arith.constant 6 : index
    %c1_104 = arith.constant 1 : index
    %98 = memref.load %arg1[%c6_103, %c1_104] : memref<8x2xi32, #tpu.memory_space<smem>>
    %99 = arith.index_cast %98 : i32 to index
    %c0_105 = arith.constant 0 : index
    %c0_106 = arith.constant 0 : index
    %100 = vector.load %arg3[%99, %c0_105, %c0_106] : memref<28x1x32xf32, #tpu.memory_space<vmem>>, vector<1x1x32xf32>
    %101 = vector.shape_cast %100 : vector<1x1x32xf32> to vector<1x32xf32>
    %c1_107 = arith.constant 1 : index
    %c0_108 = arith.constant 0 : index
    %102 = vector.load %arg9[%c1_107, %c0_108] : memref<2x32xf32, #tpu.memory_space<vmem>>, vector<1x32xf32>
    tpu.vector_store %arg9[%c1_107, %c0_108], %101 {strides = array<i32>} : memref<2x32xf32, #tpu.memory_space<vmem>>, vector<1x32xf32>,
    %c0_109 = arith.constant 0 : index
    %c0_110 = arith.constant 0 : index
    %103 = vector.load %arg9[%c0_109, %c0_110] : memref<2x32xf32, #tpu.memory_space<vmem>>, vector<2x32xf32>
    %cst_111 = arith.constant dense<0.000000e+00> : vector<2x32xf32>
    %104 = tpu.matmul %91, %0, %cst_111 {dimension_numbers = #tpu.dot_dimension_numbers<[1], [0], [0], [1], [0, 0, 1, 1], [], []>} : vector<2x32xf32>, vector<32x32xf32>, vector<2x32xf32> -> vector<2x32xf32>
    %105 = arith.addf %103, %104 : vector<2x32xf32>
    %106 = math.tanh %105 : vector<2x32xf32>
    %c12 = arith.constant 12 : index
    %c0_112 = arith.constant 0 : index
    %107 = vector.load %arg10[%c12, %c0_112] : memref<16x32xf32, #tpu.memory_space<vmem>>, vector<2x32xf32>
    tpu.vector_store %arg10[%c12, %c0_112], %106 {strides = array<i32>} : memref<16x32xf32, #tpu.memory_space<vmem>>, vector<2x32xf32>,
    %c7 = arith.constant 7 : index
    %c0_113 = arith.constant 0 : index
    %108 = memref.load %arg1[%c7, %c0_113] : memref<8x2xi32, #tpu.memory_space<smem>>
    %109 = arith.index_cast %108 : i32 to index
    %c0_114 = arith.constant 0 : index
    %c0_115 = arith.constant 0 : index
    %110 = vector.load %arg3[%109, %c0_114, %c0_115] : memref<28x1x32xf32, #tpu.memory_space<vmem>>, vector<1x1x32xf32>
    %111 = vector.shape_cast %110 : vector<1x1x32xf32> to vector<1x32xf32>
    %c0_116 = arith.constant 0 : index
    %c0_117 = arith.constant 0 : index
    %112 = vector.load %arg9[%c0_116, %c0_117] : memref<2x32xf32, #tpu.memory_space<vmem>>, vector<1x32xf32>
    tpu.vector_store %arg9[%c0_116, %c0_117], %111 {strides = array<i32>} : memref<2x32xf32, #tpu.memory_space<vmem>>, vector<1x32xf32>,
    %c7_118 = arith.constant 7 : index
    %c1_119 = arith.constant 1 : index
    %113 = memref.load %arg1[%c7_118, %c1_119] : memref<8x2xi32, #tpu.memory_space<smem>>
    %114 = arith.index_cast %113 : i32 to index
    %c0_120 = arith.constant 0 : index
    %c0_121 = arith.constant 0 : index
    %115 = vector.load %arg3[%114, %c0_120, %c0_121] : memref<28x1x32xf32, #tpu.memory_space<vmem>>, vector<1x1x32xf32>
    %116 = vector.shape_cast %115 : vector<1x1x32xf32> to vector<1x32xf32>
    %c1_122 = arith.constant 1 : index
    %c0_123 = arith.constant 0 : index
    %117 = vector.load %arg9[%c1_122, %c0_123] : memref<2x32xf32, #tpu.memory_space<vmem>>, vector<1x32xf32>
    tpu.vector_store %arg9[%c1_122, %c0_123], %116 {strides = array<i32>} : memref<2x32xf32, #tpu.memory_space<vmem>>, vector<1x32xf32>,
    %c0_124 = arith.constant 0 : index
    %c0_125 = arith.constant 0 : index
    %118 = vector.load %arg9[%c0_124, %c0_125] : memref<2x32xf32, #tpu.memory_space<vmem>>, vector<2x32xf32>
    %cst_126 = arith.constant dense<0.000000e+00> : vector<2x32xf32>
    %119 = tpu.matmul %106, %0, %cst_126 {dimension_numbers = #tpu.dot_dimension_numbers<[1], [0], [0], [1], [0, 0, 1, 1], [], []>} : vector<2x32xf32>, vector<32x32xf32>, vector<2x32xf32> -> vector<2x32xf32>
    %120 = arith.addf %118, %119 : vector<2x32xf32>
    %121 = math.tanh %120 : vector<2x32xf32>
    %c14 = arith.constant 14 : index
    %c0_127 = arith.constant 0 : index
    %122 = vector.load %arg10[%c14, %c0_127] : memref<16x32xf32, #tpu.memory_space<vmem>>, vector<2x32xf32>
    tpu.vector_store %arg10[%c14, %c0_127], %121 {strides = array<i32>} : memref<16x32xf32, #tpu.memory_space<vmem>>, vector<2x32xf32>,
    %c0_128 = arith.constant 0 : index
    %c0_129 = arith.constant 0 : index
    %c0_130 = arith.constant 0 : index
    %123 = vector.load %arg8[%c0_128, %c0_129, %c0_130] : memref<1x2x32xf32, #tpu.memory_space<vmem>>, vector<1x2x32xf32>
    %124 = vector.shape_cast %123 : vector<1x2x32xf32> to vector<2x32xf32>
    %125 = vector.shape_cast %121 : vector<2x32xf32> to vector<1x2x32xf32>
    tpu.vector_store %arg8[%c0_128, %c0_129, %c0_130], %125 {strides = array<i32>} : memref<1x2x32xf32, #tpu.memory_space<vmem>>, vector<1x2x32xf32>,
    %c0_131 = arith.constant 0 : index
    %c0_132 = arith.constant 0 : index
    %126 = vector.load %arg10[%c0_131, %c0_132] : memref<16x32xf32, #tpu.memory_space<vmem>>, vector<16x32xf32>
    %c0_133 = arith.constant 0 : index
    %c0_134 = arith.constant 0 : index
    %127 = vector.load %arg5[%c0_133, %c0_134] : memref<32x128xf32, #tpu.memory_space<vmem>>, vector<32x128xf32>
    %cst_135 = arith.constant dense<0.000000e+00> : vector<16x128xf32>
    %128 = tpu.matmul %126, %127, %cst_135 {dimension_numbers = #tpu.dot_dimension_numbers<[1], [0], [0], [1], [0, 0, 1, 1], [], []>} : vector<16x32xf32>, vector<32x128xf32>, vector<16x128xf32> -> vector<16x128xf32>
    %c0_136 = arith.constant 0 : index
    %c0_137 = arith.constant 0 : index
    %129 = vector.load %arg6[%c0_136, %c0_137] : memref<1x128xf32, #tpu.memory_space<vmem>>, vector<1x128xf32>
    %130 = vector.broadcast %129 : vector<1x128xf32> to vector<16x128xf32>
    %131 = arith.addf %128, %130 : vector<16x128xf32>
    %c0_138 = arith.constant 0 : index
    %c0_139 = arith.constant 0 : index
    %132 = vector.load %arg7[%c0_138, %c0_139] : memref<16x128xf32, #tpu.memory_space<vmem>>, vector<16x128xf32>
    tpu.vector_store %arg7[%c0_138, %c0_139], %131 {strides = array<i32>} : memref<16x128xf32, #tpu.memory_space<vmem>>, vector<16x128xf32>,
    return
  }
  func.func @transform_0(%arg0: i32, %arg1: memref<8x2xi32, #tpu.memory_space<smem>>) -> (i32, i32, i32) {
    %c0_i32 = arith.constant 0 : i32
    %c0_i32_0 = arith.constant 0 : i32
    %c0_i32_1 = arith.constant 0 : i32
    %c0_i32_2 = arith.constant 0 : i32
    return %c0_i32, %c0_i32_0, %c0_i32_1 : i32, i32, i32
  }
  func.func @transform_1(%arg0: i32, %arg1: memref<8x2xi32, #tpu.memory_space<smem>>) -> (i32, i32, i32) {
    %c0_i32 = arith.constant 0 : i32
    %c0_i32_0 = arith.constant 0 : i32
    %c0_i32_1 = arith.constant 0 : i32
    %c0_i32_2 = arith.constant 0 : i32
    return %c0_i32, %c0_i32_0, %c0_i32_1 : i32, i32, i32
  }
  func.func @transform_2(%arg0: i32, %arg1: memref<8x2xi32, #tpu.memory_space<smem>>) -> (i32, i32) {
    %c0_i32 = arith.constant 0 : i32
    %c0_i32_0 = arith.constant 0 : i32
    %c0_i32_1 = arith.constant 0 : i32
    return %c0_i32, %c0_i32_0 : i32, i32
  }
  func.func @transform_3(%arg0: i32, %arg1: memref<8x2xi32, #tpu.memory_space<smem>>) -> (i32, i32) {
    %c0_i32 = arith.constant 0 : i32
    %c0_i32_0 = arith.constant 0 : i32
    %c0_i32_1 = arith.constant 0 : i32
    return %c0_i32, %c0_i32_0 : i32, i32
  }
  func.func @transform_4(%arg0: i32, %arg1: memref<8x2xi32, #tpu.memory_space<smem>>) -> (i32, i32) {
    %c0_i32 = arith.constant 0 : i32
    %c0_i32_0 = arith.constant 0 : i32
    %c0_i32_1 = arith.constant 0 : i32
    return %c0_i32, %c0_i32_0 : i32, i32
  }
  func.func @transform_5(%arg0: i32, %arg1: memref<8x2xi32, #tpu.memory_space<smem>>) -> (i32, i32) {
    %c0_i32 = arith.constant 0 : i32
    %c0_i32_0 = arith.constant 0 : i32
    %c0_i32_1 = arith.constant 0 : i32
    return %c0_i32, %c0_i32_0 : i32, i32
  }
  func.func @transform_6(%arg0: i32, %arg1: memref<8x2xi32, #tpu.memory_space<smem>>) -> (i32, i32, i32) {
    %c0_i32 = arith.constant 0 : i32
    %c0_i32_0 = arith.constant 0 : i32
    %c0_i32_1 = arith.constant 0 : i32
    %c0_i32_2 = arith.constant 0 : i32
    return %c0_i32, %c0_i32_0, %c0_i32_1 : i32, i32, i32
  }
}

</mosaic_0001>

<bundles_post_ra>
// kernel: tpu_custom_call.1
= control target key start
LH: loop header
LB: loop body
LE: loop exit
PB: predicated region body
PF: predicated region fallthrough
CT: control target
= control target key end

     0   :  { %s1434_s0 = inlined_call_operand.vmem [shape: s32[8,2], index: 0, kind: input, shape index: {}]   ;;  %s1435_s1 = inlined_call_operand.vmem [shape: f32[1,2,32], index: 1, kind: input, shape index: {}]   ;;  %s1436_s2 = inlined_call_operand.hbm [shape: f32[28,1,32], index: 2, kind: input, shape index: {}]   ;;  %s1437_s3 = inlined_call_operand.hbm [shape: f32[32,32], index: 3, kind: input, shape index: {}]   ;;  %s1438_s4 = inlined_call_operand.hbm [shape: f32[32,128], index: 4, kind: input, shape index: {}]   ;;  %s1439_s5 = inlined_call_operand.vmem [shape: f32[1,128], index: 5, kind: input, shape index: {}]   ;;  %s1440_s6 = inlined_call_operand.hbm [shape: f32[16,128], index: 6, kind: output, shape index: {0}]   ;;  %s1441_s7 = inlined_call_operand.hbm [shape: f32[1,2,32], index: 7, kind: output, shape index: {1}]  }
   0x1   :  { %s13_s26 = sshll.u32 %s1434_s0, 4  ;;  %s14_s26 = int_to_ptr.vmem [resolvable:$true] %s13_s26 }
   0x2   :  { %s1104_s27 = scalar_lea.vmem %s14_s26, 128  ;;  %p1109_p1 = scmp.lt.s32.totalorder %s14_s26, %s14_s26 }
   0x3   :  { %p1105_p0 = scmp.ne.s32.totalorder %s14_s26, %s1104_s27  ;;  %p1110_p2 = scmp.lt.s32.totalorder %s1104_s27, %s1104_s27 }
   0x5   :  { %p1111_p3 = por %p1110_p2, %p1109_p1 }
   0x7   :  { %p1112_p4 = pnand %p1111_p3, %p1105_p0 }
   0x9   :  { %1115 = shalt.err (!%p1112_p4)  }
   0xa   :  { %s1226_s28 = smov [#allocation5]  }
   0xb   :  { %16 = dma.vmem_to_smem %s14_s26, 128, %s1226_s28, [#allocation4] }
   0xc   :  { %1216 = dma.done.wait [#allocation4], 128 }
   0xd   :  { %1217 = vsyncadd [#allocation4], 4294967168 }
   0xe   :  { %18 = sfence }
   0xf   :  { %19 = vsyncpa [#allocation7], 0 }
  0x10   :  { %20 = vsyncpa [#allocation10], 0 }
  0x11   :  { %21 = vsyncpa [#allocation8], 0 }
  0x12   :  { %22 = vsyncpa [#allocation14], 0  ;;  %s1227_s29 = smov [#allocation9]  }
  0x13   :  { %s42_s30 = sshll.u32 %s1227_s29, 4  ;;  %s43_s30 = int_to_ptr.vmem [resolvable:$true] %s42_s30 }
  0x14   :  { %s1124_s0 = scalar_lea.vmem %s43_s30, 512  ;;  %p1129_p6 = scmp.lt.s32.totalorder %s43_s30, %s43_s30 }
  0x15   :  { %p1125_p5 = scmp.ne.s32.totalorder %s43_s30, %s1124_s0  ;;  %p1130_p7 = scmp.lt.s32.totalorder %s1124_s0, %s1124_s0 }
  0x17   :  { %p1131_p8 = por %p1130_p7, %p1129_p6 }
  0x19   :  { %p1132_p9 = pnand %p1131_p8, %p1125_p5 }
  0x1b   :  { %1135 = shalt.err (!%p1132_p9)
}
  0x1c   :  { %s1228_s8 = smov 128   ;;  %s1229_s9 = smov 8  }
  0x1d   :  { %48 = dma.hbm_to_vmem [thread:$0]  %s1437_s3, 512, %s43_s30, [#allocation10], %s1228_s8, %s1228_s8, %s1229_s9  }
  0x1e   :  { %s1230_s12 = smov [#allocation6]  }
  0x1f   :  { %s30_s13 = sshll.u32 %s1230_s12, 4  ;;  %s31_s13 = int_to_ptr.vmem [resolvable:$true] %s30_s13 }
  0x20   :  { %s1144_s14 = scalar_lea.vmem %s31_s13, 448  ;;  %p1149_p11 = scmp.lt.s32.totalorder %s31_s13, %s31_s13 }
  0x21   :  { %p1145_p10 = scmp.ne.s32.totalorder %s31_s13, %s1144_s14  ;;  %p1150_p12 = scmp.lt.s32.totalorder %s1144_s14, %s1144_s14 }
  0x23   :  { %p1151_p13 = por %p1150_p12, %p1149_p11 }
  0x25   :  { %p1152_p0 = pnand %p1151_p13, %p1145_p10 }
  0x27   :  { %1155 = shalt.err (!%p1152_p0)
}
  0x28   :  { %s1231_s15 = smov 16   ;;  %s1232_s16 = smov 1  }
  0x29   :  { %36 = dma.hbm_to_vmem [thread:$0]  %s1436_s2, 448, %s31_s13, [#allocation7], %s1231_s15, %s1231_s15, %s1232_s16  }
  0x2a   :  { %s1233_s19 = smov [#allocation11]  }
  0x2b   :  { %s54_s20 = sshll.u32 %s1233_s19, 4  ;;  %s55_s20 = int_to_ptr.vmem [resolvable:$true] %s54_s20 }
  0x2c   :  { %s1164_s3 = scalar_lea.vmem %s55_s20, 512  ;;  %p1169_p2 = scmp.lt.s32.totalorder %s55_s20, %s55_s20 }
  0x2d   :  { %p1165_p1 = scmp.ne.s32.totalorder %s55_s20, %s1164_s3  ;;  %p1170_p3 = scmp.lt.s32.totalorder %s1164_s3, %s1164_s3 }
  0x2f   :  { %p1171_p4 = por %p1170_p3, %p1169_p2 }
  0x31   :  { %p1172_p5 = pnand %p1171_p4, %p1165_p1 }
  0x33   :  { %1175 = shalt.err (!%p1172_p5)
}
  0x34   :  { %60 = dma.hbm_to_vmem [thread:$0]  %s1438_s4, 512, %s55_s20, [#allocation10], %s1228_s8, %s1228_s8, %s1229_s9  }
  0x35   :  { %1218 = dma.done.wait [#allocation7], 448  }
  0x36   :  { %1219 = vsyncadd [#allocation7], 4294966848 }
  0x37   :  { %1220 = dma.done.wait [#allocation10], 1024  }
  0x38   :  { %1221 = vsyncadd [#allocation10], 4294966272  ;;  %v1234_v0 = vmov 0.0   ;;  %vm1235_vm0 = vmmov 0   ;;  %s77_s2 = sld [smem:[#allocation5]]  ;;  %vm80_vm1 = vcmask 253952  }
  0x39   :  { %977 = vmatprep.subr.mxu0 %v1234_v0  ;;  %985 = vmatprep.mubr.msk.f32.mxu0 %vm1235_vm0, %v1234_v0  ;;  %s905_s23 = sld [smem:[#allocation5 + $0x1]]  ;;  %v1302_v1 = vld [vmem:[#allocation9 + $0x18] sm:$0xff]  ;;  %v1304_v2 = vld [vmem:[#allocation9 + $0x10] sm:$0xff]  ;;  %v1309_v4 = vld [vmem:[#allocation9 + $0x8] sm:$0xff]  ;;  %vm87_vm2 = vcmask 261120   ;;  %vm163_vm3 = vcmask 254976  }
  0x3a   :  { %988 = vmatprep.subr.mxu1 %v1234_v0  ;;  %996 = vmatprep.mubr.msk.f32.mxu1 %vm1235_vm0, %v1234_v0  ;;  %v1317_v6 = vld [vmem:[#allocation9] sm:$0xff]  ;;  %v76_v7 = vld [vmem:[%s1435_s1] sm:$0x3]  ;;  %s907_s1 = sld [smem:[#allocation5 + $0x80]]  ;;  %v766_v58 = vld [vmem:[#allocation11 + $0x18] sm:$0xff] }
  0x3b   :  { %978 = vmatpush3.msra.mxu0 %v1302_v1  ;;  %989 = vmatpush3.msra.mxu1 %v1302_v1  ;;  %s908_s27 = sld [smem:[#allocation5 + $0x81]]  ;;  %v765_v59 = vld [vmem:[#allocation11 + $0x10] sm:$0xff]  ;;  %v764_v60 = vld [vmem:[#allocation11 + $0x8] sm:$0xff]  ;;  %v763_v61 = vld [vmem:[#allocation11] sm:$0xff] }
  0x3c   :  { %979 = vmatprep.subr.mxu0 %v1234_v0  ;;  %990 = vmatprep.subr.mxu1 %v1234_v0  ;;  %s910_s30 = sld [smem:[#allocation5 + $0x100]] }
  0x3d   :  { %980 = vmatpush3.msra.mxu0 %v1304_v2  ;;  %991 = vmatpush3.msra.mxu1 %v1304_v2  ;;  %s911_s0 = sld [smem:[#allocation5 + $0x101]] }
  0x3e   :  { %s78_s4 = scalar_lea.vmem [#allocation6], %s77_s2  ;;  %981 = vmatprep.subr.mxu0 %v1234_v0  ;;  %992 = vmatprep.subr.mxu1 %v1234_v0  ;;  %s913_s12 = sld [smem:[#allocation5 + $0x180]] }
  0x3f   :  { %v79_v3 = vld [vmem:[%s78_s4] sm:$0x1]  ;;  %s83_s24 = scalar_lea.vmem [#allocation6], %s905_s23  ;;  %982 = vmatpush3.msra.mxu0 %v1309_v4  ;;  %993 = vmatpush3.msra.mxu1 %v1309_v4  ;;  %s914_s13 = sld [smem:[#allocation5 + $0x181]] }
  0x40   :  { %81 = vst.msk [vmem:[#allocation2] sm:$0x1] %vm80_vm1, %v79_v3  ;;  %v84_v5 = vld [vmem:[%s83_s24] sm:$0x1]  ;;  %983 = vmatprep.subr.mxu0 %v1234_v0  ;;  %994 = vmatprep.subr.mxu1 %v1234_v0  ;;  %s166_s28 = scalar_lea.vmem [#allocation6], %s907_s1  ;;  %s916_s16 = sld [smem:[#allocation5 + $0x200]] }
  0x41   :  { %85 = vst.msk [vmem:[#allocation2 + $0x1] sm:$0x1] %vm80_vm1, %v84_v5  ;;  %984 = vmatpush3.msra.mxu0 %v1317_v6  ;;  %995 = vmatpush3.msra.mxu1 %v1317_v6  ;;  %v167_v9 = vld [vmem:[%s166_s28] sm:$0x1]  ;;  %s170_s29 = scalar_lea.vmem [#allocation6], %s908_s27  ;;  %s917_s17 = sld [smem:[#allocation5 + $0x201]] }
  0x42   :  { %986 = vmatmul.mubr.msk.f32.vlgmr.msra.gmra.mxu0 %vm87_vm2, %v76_v7  ;;  %999 = vmatprep.subr.mxu0 %v1234_v0  ;;  %v171_v10 = vld [vmem:[%s170_s29] sm:$0x1]  ;;  %s251_s10 = scalar_lea.vmem [#allocation6], %s910_s30  ;;  %s919_s20 = sld [smem:[#allocation5 + $0x280]] }
  0x43   :  { %1000 = vmatpush3.msra.mxu0 %v1302_v1  ;;  %1007 = vmatprep.mubr.msk.f32.mxu0 %vm1235_vm0, %v1234_v0  ;;  %v252_v16 = vld [vmem:[%s251_s10] sm:$0x1]  ;;  %s255_s11 = scalar_lea.vmem [#allocation6], %s911_s0  ;;  %s920_s3 = sld [smem:[#allocation5 + $0x281]] }
  0x44   :  { %1001 = vmatprep.subr.mxu0 %v1234_v0  ;;  %1010 = vmatprep.subr.mxu1 %v1234_v0  ;;  %v256_v17 = vld [vmem:[%s255_s11] sm:$0x1]  ;;  %s336_s14 = scalar_lea.vmem [#allocation6], %s913_s12  ;;  %s922_s2 = sld [smem:[#allocation5 + $0x300]] }
  0x45   :  { %1002 = vmatpush3.msra.mxu0 %v1304_v2  ;;  %v337_v23 = vld [vmem:[%s336_s14] sm:$0x1]  ;;  %s340_s15 = scalar_lea.vmem [#allocation6], %s914_s13  ;;  %s923_s23 = sld [smem:[#allocation5 + $0x301]] }
  0x46   :  { %1003 = vmatprep.subr.mxu0 %v1234_v0  ;;  %v341_v24 = vld [vmem:[%s340_s15] sm:$0x1]  ;;  %s421_s18 = scalar_lea.vmem [#allocation6], %s916_s16  ;;  %s925_s25 = sld [smem:[#allocation5 + $0x380]] }
  0x47   :  { %1004 = vmatpush3.msra.mxu0 %v1309_v4  ;;  %v422_v30 = vld [vmem:[%s421_s18] sm:$0x1]  ;;  %s425_s19 = scalar_lea.vmem [#allocation6], %s917_s17  ;;  %s926_s26 = sld [smem:[#allocation5 + $0x381]] }
  0x48   :  { %1005 = vmatprep.subr.mxu0 %v1234_v0  ;;  %v86_v8 = vld [vmem:[#allocation2] sm:$0x3]  ;;  %s506_s21 = scalar_lea.vmem [#allocation6], %s919_s20  ;;  %s1236_s28 = smov [#allocation13]  }
  0x49   :  { %1006 = vmatpush3.msra.mxu0 %v1317_v6  ;;  %168 = vst.msk [vmem:[#allocation2] sm:$0x1] %vm80_vm1, %v167_v9  ;;  %172 = vst.msk [vmem:[#allocation2 + $0x1] sm:$0x1] %vm80_vm1, %v171_v10  ;;  %v426_v31 = vld [vmem:[%s425_s19] sm:$0x1] }
  0x4a   :  { %1021 = vmatprep.subr.mxu0 %v1234_v0  ;;  %v507_v37 = vld [vmem:[%s506_s21] sm:$0x1]  ;;  %s510_s22 = scalar_lea.vmem [#allocation6], %s920_s3  ;;  %s591_s4 = scalar_lea.vmem [#allocation6], %s922_s2 }
  0x4b   :  { %v511_v38 = vld [vmem:[%s510_s22] sm:$0x1]  ;;  %s595_s24 = scalar_lea.vmem [#allocation6], %s923_s23  ;;  %s875_s29 = sshll.u32 %s1236_s28, 4  ;;  %s876_s29 = int_to_ptr.vmem [resolvable:$true] %s875_s29 }
  0x4c   :  { %v592_v44 = vld [vmem:[%s591_s4] sm:$0x1]  ;;  %s676_s1 = scalar_lea.vmem [#allocation6], %s925_s25  ;;  %s1176_s30 = scalar_lea.vmem %s876_s29, 32 }
  0x4d   :  { %v596_v45 = vld [vmem:[%s595_s24] sm:$0x1]  ;;  %s680_s27 = scalar_lea.vmem [#allocation6], %s926_s26  ;;  %p1177_p6 = scmp.ne.s32.totalorder %s876_s29, %s1176_s30 }
  0x4e   :  { %v677_v52 = vld [vmem:[%s676_s1] sm:$0x1]  ;;  %p1181_p7 = scmp.lt.s32.totalorder %s876_s29, %s876_s29  ;;  %p1182_p8 = scmp.lt.s32.totalorder %s1176_s30, %s1176_s30 }
  0x4f   :  { %v681_v53 = vld [vmem:[%s680_s27] sm:$0x1] }
  0x50   :  { %v173_v15 = vld [vmem:[#allocation2] sm:$0x3]  ;;  %p1183_p9 = por %p1182_p8, %p1181_p7 }
  0x51   :  { %253 = vst.msk [vmem:[#allocation2] sm:$0x1] %vm80_vm1, %v252_v16  ;;  %257 = vst.msk [vmem:[#allocation2 + $0x1] sm:$0x1] %vm80_vm1, %v256_v17 }
  0x52   :  { %p1184_p10 = pnand %p1183_p9, %p1177_p6 }
  0x58   :  { %v258_v22 = vld [vmem:[#allocation2] sm:$0x3] }
  0x59   :  { %338 = vst.msk [vmem:[#allocation2] sm:$0x1] %vm80_vm1, %v337_v23  ;;  %342 = vst.msk [vmem:[#allocation2 + $0x1] sm:$0x1] %vm80_vm1, %v341_v24 }
  0x60   :  { %v343_v29 = vld [vmem:[#allocation2] sm:$0x3] }
  0x61   :  { %423 = vst.msk [vmem:[#allocation2] sm:$0x1] %vm80_vm1, %v422_v30  ;;  %427 = vst.msk [vmem:[#allocation2 + $0x1] sm:$0x1] %vm80_vm1, %v426_v31 }
  0x68   :  { %v428_v36 = vld [vmem:[#allocation2] sm:$0x3] }
  0x69   :  { %508 = vst.msk [vmem:[#allocation2] sm:$0x1] %vm80_vm1, %v507_v37  ;;  %512 = vst.msk [vmem:[#allocation2 + $0x1] sm:$0x1] %vm80_vm1, %v511_v38 }
  0x70   :  { %v513_v43 = vld [vmem:[#allocation2] sm:$0x3] }
  0x71   :  { %593 = vst.msk [vmem:[#allocation2] sm:$0x1] %vm80_vm1, %v592_v44  ;;  %597 = vst.msk [vmem:[#allocation2 + $0x1] sm:$0x1] %vm80_vm1, %v596_v45 }
  0x78   :  { %v598_v51 = vld [vmem:[#allocation2] sm:$0x3] }
  0x79   :  { %678 = vst.msk [vmem:[#allocation2] sm:$0x1] %vm80_vm1, %v677_v52  ;;  %682 = vst.msk [vmem:[#allocation2 + $0x1] sm:$0x1] %vm80_vm1, %v681_v53 }
  0x80   :  { %v683_v62 = vld [vmem:[#allocation2] sm:$0x3] }
 0x102   :  { %v157_v11 = vpop.f32.mrf.mxu0 }
 0x103   :  { %v161_v12 = vadd.f32 %v157_v11, %v86_v8 }
 0x104   :  { %v987_v13 = vpop.f32.mrf.mxu0 }
 0x105   :  { %1088 = vtanh.f32 %v161_v12 }
 0x112   :  { %v1089_v14 = vpop.eup %1088 }
 0x113   :  { %164 = vst.msk [vmem:[#allocation3] sm:$0x3] %vm163_vm3, %v1089_v14  ;;  %997 = vmatmul.mubr.msk.f32.vlgmr.msra.gmra.mxu1 %vm87_vm2, %v1089_v14 }
 0x114   :  { %1011 = vmatpush3.msra.mxu1 %v1302_v1  ;;  %1018 = vmatprep.mubr.msk.f32.mxu1 %vm1235_vm0, %v1234_v0 }
 0x115   :  { %1012 = vmatprep.subr.mxu1 %v1234_v0 }
 0x116   :  { %1013 = vmatpush3.msra.mxu1 %v1304_v2 }
 0x117   :  { %1014 = vmatprep.subr.mxu1 %v1234_v0 }
 0x118   :  { %1015 = vmatpush3.msra.mxu1 %v1309_v4 }
 0x119   :  { %1016 = vmatprep.subr.mxu1 %v1234_v0 }
 0x11a   :  { %1017 = vmatpush3.msra.mxu1 %v1317_v6 }
 0x11b   :  { %1032 = vmatprep.subr.mxu1 %v1234_v0 }
 0x1d3   :  { %v243_v18 = vpop.f32.mrf.mxu1 }
 0x1d4   :  { %v247_v19 = vadd.f32 %v243_v18, %v173_v15 }
 0x1d5   :  { %v998_v20 = vpop.f32.mrf.mxu1 }
 0x1d6   :  { %1090 = vtanh.f32 %v247_v19 }
 0x1e3   :  { %v1091_v21 = vpop.eup %1090 }
 0x1e4   :  { %249 = vst.msk [vmem:[#allocation3 + $0x2] sm:$0x3] %vm163_vm3, %v1091_v21  ;;  %1008 = vmatmul.mubr.msk.f32.vlgmr.msra.gmra.mxu0 %vm87_vm2, %v1091_v21 }
 0x1e5   :  { %1022 = vmatpush3.msra.mxu0 %v1302_v1  ;;  %1029 = vmatprep.mubr.msk.f32.mxu0 %vm1235_vm0, %v1234_v0 }
 0x1e6   :  { %1023 = vmatprep.subr.mxu0 %v1234_v0 }
 0x1e7   :  { %1024 = vmatpush3.msra.mxu0 %v1304_v2 }
 0x1e8   :  { %1025 = vmatprep.subr.mxu0 %v1234_v0 }
 0x1e9   :  { %1026 = vmatpush3.msra.mxu0 %v1309_v4 }
 0x1ea   :  { %1027 = vmatprep.subr.mxu0 %v1234_v0 }
 0x1eb   :  { %1028 = vmatpush3.msra.mxu0 %v1317_v6 }
 0x1ec   :  { %1043 = vmatprep.subr.mxu0 %v1234_v0 }
 0x2a4   :  { %v328_v25 = vpop.f32.mrf.mxu0 }
 0x2a5   :  { %v332_v26 = vadd.f32 %v328_v25, %v258_v22 }
 0x2a6   :  { %v1009_v27 = vpop.f32.mrf.mxu0 }
 0x2a7   :  { %1092 = vtanh.f32 %v332_v26 }
 0x2b4   :  { %v1093_v28 = vpop.eup %1092 }
 0x2b5   :  { %334 = vst.msk [vmem:[#allocation3 + $0x4] sm:$0x3] %vm163_vm3, %v1093_v28  ;;  %1019 = vmatmul.mubr.msk.f32.vlgmr.msra.gmra.mxu1 %vm87_vm2, %v1093_v28 }
 0x2b6   :  { %1033 = vmatpush3.msra.mxu1 %v1302_v1  ;;  %1040 = vmatprep.mubr.msk.f32.mxu1 %vm1235_vm0, %v1234_v0 }
 0x2b7   :  { %1034 = vmatprep.subr.mxu1 %v1234_v0 }
 0x2b8   :  { %1035 = vmatpush3.msra.mxu1 %v1304_v2 }
 0x2b9   :  { %1036 = vmatprep.subr.mxu1 %v1234_v0 }
 0x2ba   :  { %1037 = vmatpush3.msra.mxu1 %v1309_v4 }
 0x2bb   :  { %1038 = vmatprep.subr.mxu1 %v1234_v0 }
 0x2bc   :  { %1039 = vmatpush3.msra.mxu1 %v1317_v6 }
 0x2bd   :  { %1054 = vmatprep.subr.mxu1 %v1234_v0 }
 0x375   :  { %v413_v32 = vpop.f32.mrf.mxu1 }
 0x376   :  { %v417_v33 = vadd.f32 %v413_v32, %v343_v29 }
 0x377   :  { %v1020_v34 = vpop.f32.mrf.mxu1 }
 0x378   :  { %1094 = vtanh.f32 %v417_v33 }
 0x385   :  { %v1095_v35 = vpop.eup %1094 }
 0x386   :  { %419 = vst.msk [vmem:[#allocation3 + $0x6] sm:$0x3] %vm163_vm3, %v1095_v35  ;;  %1030 = vmatmul.mubr.msk.f32.vlgmr.msra.gmra.mxu0 %vm87_vm2, %v1095_v35 }
 0x387   :  { %1044 = vmatpush3.msra.mxu0 %v1302_v1  ;;  %1051 = vmatprep.mubr.msk.f32.mxu0 %vm1235_vm0, %v1234_v0 }
 0x388   :  { %1045 = vmatprep.subr.mxu0 %v1234_v0 }
 0x389   :  { %1046 = vmatpush3.msra.mxu0 %v1304_v2 }
 0x38a   :  { %1047 = vmatprep.subr.mxu0 %v1234_v0 }
 0x38b   :  { %1048 = vmatpush3.msra.mxu0 %v1309_v4 }
 0x38c   :  { %1049 = vmatprep.subr.mxu0 %v1234_v0 }
 0x38d   :  { %1050 = vmatpush3.msra.mxu0 %v1317_v6  ;;  %v761_v50 = vld [vmem:[#allocation3] sm:$0xff] }
 0x38e   :  { %1065 = vmatprep.subr.mxu0 %v766_v58 }
 0x446   :  { %v498_v39 = vpop.f32.mrf.mxu0 }
 0x447   :  { %v502_v40 = vadd.f32 %v498_v39, %v428_v36 }
 0x448   :  { %v1031_v41 = vpop.f32.mrf.mxu0 }
 0x449   :  { %1096 = vtanh.f32 %v502_v40 }
 0x456   :  { %v1097_v42 = vpop.eup %1096 }
 0x457   :  { %504 = vst.msk [vmem:[#allocation3 + $0x8] sm:$0x3] %vm163_vm3, %v1097_v42  ;;  %1041 = vmatmul.mubr.msk.f32.vlgmr.msra.gmra.mxu1 %vm87_vm2, %v1097_v42 }
 0x458   :  { %1055 = vmatpush3.msra.mxu1 %v1302_v1  ;;  %1062 = vmatprep.mubr.msk.f32.mxu1 %vm1235_vm0, %v1234_v0 }
 0x459   :  { %1056 = vmatprep.subr.mxu1 %v1234_v0 }
 0x45a   :  { %1057 = vmatpush3.msra.mxu1 %v1304_v2 }
 0x45b   :  { %1058 = vmatprep.subr.mxu1 %v1234_v0 }
 0x45c   :  { %1059 = vmatpush3.msra.mxu1 %v1309_v4 }
 0x45d   :  { %1060 = vmatprep.subr.mxu1 %v1234_v0 }
 0x45e   :  { %1061 = vmatpush3.msra.mxu1 %v1317_v6 }
 0x517   :  { %v583_v46 = vpop.f32.mrf.mxu1 }
 0x518   :  { %v587_v47 = vadd.f32 %v583_v46, %v513_v43 }
 0x519   :  { %v1042_v48 = vpop.f32.mrf.mxu1 }
 0x51a   :  { %1098 = vtanh.f32 %v587_v47 }
 0x527   :  { %v1099_v49 = vpop.eup %1098 }
 0x528   :  { %589 = vst.msk [vmem:[#allocation3 + $0xa] sm:$0x3] %vm163_vm3, %v1099_v49  ;;  %1052 = vmatmul.mubr.msk.f32.vlgmr.msra.gmra.mxu0 %vm87_vm2, %v1099_v49 }
 0x529   :  { %1073 = vmatprep.mubr.msk.f32.mxu0 %vm87_vm2, %v761_v50  ;;  %1066 = vmatpush3.msra.mxu0 %v766_v58 }
 0x52a   :  { %1067 = vmatprep.subr.mxu0 %v765_v59 }
 0x52b   :  { %1068 = vmatpush3.msra.mxu0 %v765_v59 }
 0x52c   :  { %1069 = vmatprep.subr.mxu0 %v764_v60 }
 0x52d   :  { %1070 = vmatpush3.msra.mxu0 %v764_v60 }
 0x52e   :  { %1071 = vmatprep.subr.mxu0 %v763_v61 }
 0x52f   :  { %1072 = vmatpush3.msra.mxu0 %v763_v61 }
 0x5e8   :  { %v668_v54 = vpop.f32.mrf.mxu0 }
 0x5e9   :  { %v672_v55 = vadd.f32 %v668_v54, %v598_v51 }
 0x5ea   :  { %v1053_v56 = vpop.f32.mrf.mxu0 }
 0x5eb   :  { %1100 = vtanh.f32 %v672_v55 }
 0x5f8   :  { %v1101_v57 = vpop.eup %1100 }
 0x5f9   :  { %674 = vst.msk [vmem:[#allocation3 + $0xc] sm:$0x3] %vm163_vm3, %v1101_v57  ;;  %1063 = vmatmul.mubr.msk.f32.vlgmr.msra.gmra.mxu1 %vm87_vm2, %v1101_v57 }
 0x6b9   :  { %v753_v63 = vpop.f32.mrf.mxu1 }
 0x6ba   :  { %v757_v0 = vadd.f32 %v753_v63, %v683_v62 }
 0x6bb   :  { %v1064_v1 = vpop.f32.mrf.mxu1 }
 0x6bc   :  { %1102 = vtanh.f32 %v757_v0 }
 0x6c9   :  { %v1103_v2 = vpop.eup %1102 }
 0x6ca   :  { %759 = vst.msk [vmem:[#allocation3 + $0xe] sm:$0x3] %vm163_vm3, %v1103_v2  ;;  %760 = vst.msk [vmem:[#allocation13] sm:$0x3] %vm163_vm3, %v1103_v2 }
 0x6d1   :  { %v762_v3 = vld [vmem:[#allocation3 + $0x8] sm:$0xff] }
 0x6d2   :  { %1074 = vmatmul.mubr.msk.f32.vlgmr.msra.gmra.mxu0 %vm87_vm2, %v762_v3 }
 0x6d3   :  { %1187 = shalt.err (!%p1184_p10)
}
 0x6d4   :  { %878 = dma.vmem_to_hbm [thread:$0]  %s876_s29, 32, %s1441_s7, [#allocation14]   ;;  %v928_v4 = vld [vmem:[%s1439_s5] ss:$0 sm:$0xff] }
 0x6d5   :  { %s1237_s13 = smov [#allocation12]  }
 0x6d6   :  { %s862_s14 = sshll.u32 %s1237_s13, 4  ;;  %s863_s14 = int_to_ptr.vmem [resolvable:$true] %s862_s14 }
 0x6d7   :  { %s1196_s15 = scalar_lea.vmem %s863_s14, 256  ;;  %p1201_p12 = scmp.lt.s32.totalorder %s863_s14, %s863_s14 }
 0x6d8   :  { %p1197_p11 = scmp.ne.s32.totalorder %s863_s14, %s1196_s15  ;;  %p1202_p13 = scmp.lt.s32.totalorder %s1196_s15, %s1196_s15 }
 0x6da   :  { %p1203_p0 = por %p1202_p13, %p1201_p12 }
 0x6dc   :  { %p1204_p1 = pnand %p1203_p0, %p1197_p11 }
 0x792   :  { %v1075_v5 = vpop.f32.mrf.mxu0 }
 0x793   :  { %v852_v6 = vadd.f32 %v1075_v5, %v928_v4 }
 0x794   :  { %v846_v7 = vpop.f32.mrf.mxu0 }
 0x795   :  { %856 = vst [vmem:[#allocation12 + $0x8] sm:$0xff] %v852_v6  ;;  %v847_v8 = vadd.f32 %v928_v4, %v846_v7 }
 0x797   :  { %855 = vst [vmem:[#allocation12] sm:$0xff] %v847_v8 }
 0x798   :  { %1207 = shalt.err (!%p1204_p1)
}
 0x799   :  { %868 = dma.vmem_to_hbm [thread:$0]  %s863_s14, 256, %s1440_s6, [#allocation8], %s1228_s8, %s1228_s8, %s1229_s9  }
 0x79a   :  { %1222 = dma.done.wait [#allocation8], 256  }
 0x79b   :  { %1223 = vsyncadd [#allocation8], 4294967040 }
 0x79c   :  { %1224 = dma.done.wait [#allocation14], 32  }
 0x79d   :  { %1225 = vsyncadd [#allocation14], 4294967264 }
 0x79e   :  { %885 = vsyncpa [#allocation7], 1 }
 0x79f   :  { %886 = vsyncpa [#allocation10], 1 }
 0x7a0   :  { %887 = vsyncpa [#allocation8], 1 }
 0x7a1   :  { %888 = vsyncpa [#allocation14], 1 }

</bundles_post_ra>
